<compile_context>
chip_gen: v7x
topology: tpu7x:2x2x1
jax: 0.10.0
libtpu: 0.0.40
codegen_flags: <defaults>
</compile_context>

<pallas_src>
from functools import partial

import numpy as np
import jax
import jax.numpy as jnp
from jax.experimental import pallas as pl
from jax.experimental.pallas import tpu as pltpu


# ----------------------------------------------------------------------------
# Fused kernel: weighted CE over all heads + supervised contrastive loss.
#   refs = (head_0, ..., head_{S-1}, x_fsm, targets_row, targets_col, out)
# ----------------------------------------------------------------------------
def _fused_loss_kernel(*refs, weights, alpha):
    n_heads = len(weights)
    head_refs = refs[:n_heads]
    x_ref = refs[n_heads]
    trow_ref = refs[n_heads + 1]
    tcol_ref = refs[n_heads + 2]
    out_ref = refs[n_heads + 3]

    trow = trow_ref[...]                                   # (1, B) int32, lane-dense
    tcol = tcol_ref[...]                                   # (B, 1) int32, sublane-dense
    B = trow.shape[1]
    C = head_refs[0].shape[1]

    # ---- weighted cross-entropy over all logit heads (static unrolled loop) ----
    # Class-index iota and one-hot are identical for every head -> hoisted once.
    cls = jax.lax.broadcasted_iota(jnp.int32, (B, C), 1)   # (B, C) column index
    onehot = (cls == tcol).astype(jnp.float32)             # (B, C)

    total = jnp.zeros((1, 1), jnp.float32)
    for w, h_ref in zip(weights, head_refs):
        logits = h_ref[...].astype(jnp.float32)            # [B, C], cast in-kernel
        m = jnp.max(logits, axis=-1, keepdims=True)        # [B, 1]
        lse = m + jnp.log(jnp.sum(jnp.exp(logits - m), axis=-1, keepdims=True))
        picked = jnp.sum(logits * onehot, axis=-1, keepdims=True)
        total = total + (w / B) * jnp.sum(lse - picked, axis=(0, 1), keepdims=True)

    # ---- supervised contrastive cosine loss ----
    x = x_ref[...].astype(jnp.float32)                     # [B, D]
    sq = jnp.sum(x * x, axis=-1, keepdims=True)            # [B, 1]
    # rsqrt(max(sq, 1e-16)) == 1 / max(sqrt(sq), 1e-8): same eps clamp, EUP op.
    xn = x * jax.lax.rsqrt(jnp.maximum(sq, 1e-16))         # [B, D] unit rows
    xn_bf = xn.astype(jnp.bfloat16)                        # bf16-native MXU feed
    gram = jax.lax.dot_general(                            # [B, B], f32 accumulate
        xn_bf, xn_bf, (((1,), (1,)), ((), ())),
        preferred_element_type=jnp.float32)

    mask = (tcol == trow).astype(jnp.float32)              # [B, B]
    elems = mask * (1.0 - gram) + (1.0 - mask) * jnp.maximum(gram - alpha, 0.0)
    # Diagonal contributes exactly 0 in exact math (self-cosine == 1, mask == 1);
    # zero it explicitly to remove the bf16-MXU rounding bias on the diagonal.
    ridx = jax.lax.broadcasted_iota(jnp.int32, (B, B), 0)
    cidx = jax.lax.broadcasted_iota(jnp.int32, (B, B), 1)
    elems = jnp.where(ridx == cidx, 0.0, elems)
    total = total + jnp.sum(elems, axis=(0, 1), keepdims=True) * (1.0 / (B * B))

    out_ref[...] = total


# ----------------------------------------------------------------------------
# Wrapper: one pallas_call, whole-array VMEM blocks, no grid.
# ----------------------------------------------------------------------------
def swin_fc_loss(x_list, x_fsm, targets,
                 num_stages=3, branch_rate=(0.4, 0.6, 0.8), alpha=0.4):
    # Stage heads (weights beta[i]) + final swin head (weight 1.0), native dtype.
    heads = [x_list[i] for i in range(num_stages)] + [x_list[-1]]
    weights = tuple(float(b) for b in branch_rate[:num_stages]) + (1.0,)
    n_heads = len(heads)

    B, D = x_fsm.shape
    C = heads[0].shape[1]
    assert all(h.shape == (B, C) for h in heads), "all logit heads must share (B, C)"

    tgt = jnp.asarray(targets)
    if tgt.ndim == 2:
        # TODO(synk): PyTorch F.cross_entropy would use the 2-D soft labels directly
        # for the CE terms; here soft labels are argmax'd to hard indices for both
        # the CE and contrastive paths.
        tgt = jnp.argmax(tgt, axis=1)
    tgt = tgt.astype(jnp.int32)
    trow = tgt.reshape(1, B)                               # lane-dense row (mask cols)
    tcol = tgt.reshape(B, 1)                               # tiny column (one-hot rows)

    # VMEM budget derived from shapes: f32 copies of all inputs + (B,B) gram/mask/
    # elems temporaries + (B,C) one-hot/logit temporaries, 2x headroom, capped at
    # v7x's 64 MiB physical VMEM (scoped defaults are 16/32 MiB and would be the
    # first thing this whole-array design trips over at production sizes).
    f32_in_bytes = 4 * (n_heads * B * C + B * D + 2 * B)
    temp_bytes = 4 * (3 * B * B + 2 * B * C + 2 * B * D)
    vmem_bytes = int(min(max(2 * (f32_in_bytes + temp_bytes), 4 * 1024 * 1024),
                         64 * 1024 * 1024))

    cost = pl.CostEstimate(
        flops=int(n_heads * 6 * B * C + 2 * B * B * D + 5 * B * D + 4 * B * B),
        transcendentals=int(n_heads * B * C + n_heads * B + B),
        bytes_accessed=int(sum(h.size * h.dtype.itemsize for h in heads)
                           + x_fsm.size * x_fsm.dtype.itemsize + 8 * B + 4),
    )

    vmem_spec = pl.BlockSpec(memory_space=pltpu.MemorySpace.VMEM)
    out = pl.pallas_call(
        partial(_fused_loss_kernel, weights=weights, alpha=float(alpha)),
        out_shape=jax.ShapeDtypeStruct((1, 1), jnp.float32),
        in_specs=[vmem_spec] * (n_heads + 3),
        out_specs=vmem_spec,
        compiler_params=pltpu.CompilerParams(vmem_limit_bytes=vmem_bytes),
        cost_estimate=cost,
    )(*heads, x_fsm, trow, tcol)
    return out[0, 0]


# ----------------------------------------------------------------------------
# Pure-JAX reference (mirrors the PyTorch forward) for a correctness check.
# ----------------------------------------------------------------------------
def _reference(x_list, x_fsm, targets,
               num_stages=3, branch_rate=(0.4, 0.6, 0.8), alpha=0.4):
    def ce(logits, t):
        logits = logits.astype(jnp.float32)
        lse = jax.scipy.special.logsumexp(logits, axis=-1)
        picked = jnp.take_along_axis(logits, t[:, None], axis=-1)[:, 0]
        return jnp.mean(lse - picked)

    t = jnp.asarray(targets).astype(jnp.int32)
    loss = ce(x_list[-1], t)
    for i in range(num_stages):
        loss = loss + branch_rate[i] * ce(x_list[i], t)

    x = x_fsm.astype(jnp.float32)
    xn = x / jnp.maximum(jnp.linalg.norm(x, axis=-1, keepdims=True), 1e-8)
    cos = xn @ xn.T
    mask = (t[:, None] == t[None, :]).astype(jnp.float32)
    loss_con = jnp.mean(mask * (1.0 - cos) +
                        (1.0 - mask) * jnp.maximum(cos - alpha, 0.0))
    return loss + loss_con


if __name__ == "__main__":
    key = jax.random.PRNGKey(0)
    B, C, D = 8, 16, 32
    NUM_STAGES = 3

    keys = jax.random.split(key, 6)
    # num_stages stage heads + 1 final swin head, each [B, C]
    x_list = [jax.random.normal(keys[i], (B, C), dtype=jnp.float32)
              for i in range(NUM_STAGES + 1)]
    x_fsm = jax.random.normal(keys[4], (B, D), dtype=jnp.float32)
    targets = jax.random.randint(keys[5], (B,), 0, C, dtype=jnp.int32)

    out = swin_fc_loss(x_list, x_fsm, targets,
                       num_stages=NUM_STAGES,
                       branch_rate=(0.4, 0.6, 0.8), alpha=0.4)
    out = jax.block_until_ready(out)

    ref = _reference(x_list, x_fsm, targets,
                     num_stages=NUM_STAGES,
                     branch_rate=(0.4, 0.6, 0.8), alpha=0.4)
    # Tolerance covers the bf16-fed MXU gram on off-diagonal cosine terms
    # (diagonal bias is removed in-kernel); the CE path stays fully f32.
    np.testing.assert_allclose(np.asarray(out), np.asarray(ref),
                               rtol=5e-3, atol=5e-3)
    print("KERNEL_OK")
</pallas_src>

<mosaic_0001>
module attributes {stable_mosaic.version = 11 : i64} {
  func.func @_fused_loss_kernel(%arg0: memref<8x16xf32, #tpu.memory_space<vmem>>, %arg1: memref<8x16xf32, #tpu.memory_space<vmem>>, %arg2: memref<8x16xf32, #tpu.memory_space<vmem>>, %arg3: memref<8x16xf32, #tpu.memory_space<vmem>>, %arg4: memref<8x32xf32, #tpu.memory_space<vmem>>, %arg5: memref<1x8xi32, #tpu.memory_space<vmem>>, %arg6: memref<8x1xi32, #tpu.memory_space<vmem>>, %arg7: memref<1x1xf32, #tpu.memory_space<vmem>>) attributes {dimension_semantics = [], scalar_prefetch = 0 : i64, scratch_operands = 0 : i64, tpu.core_type = #tpu.core_type<tc>} {
    %c0 = arith.constant 0 : index
    %c0_0 = arith.constant 0 : index
    %0 = vector.load %arg5[%c0, %c0_0] : memref<1x8xi32, #tpu.memory_space<vmem>>, vector<1x8xi32>
    %c0_1 = arith.constant 0 : index
    %c0_2 = arith.constant 0 : index
    %1 = vector.load %arg6[%c0_1, %c0_2] : memref<8x1xi32, #tpu.memory_space<vmem>>, vector<8x1xi32>
    %2 = tpu.iota {dimensions = array<i32: 1>} : vector<8x16xi32>
    %3 = vector.broadcast %1 : vector<8x1xi32> to vector<8x16xi32>
    %4 = arith.cmpi eq, %2, %3 : vector<8x16xi32>
    %5 = arith.extui %4 : vector<8x16xi1> to vector<8x16xi32>
    %6 = arith.sitofp %5 : vector<8x16xi32> to vector<8x16xf32>
    %cst = arith.constant 0.000000e+00 : f32
    %7 = vector.broadcast %cst : f32 to vector<1x1xf32>
    %c0_3 = arith.constant 0 : index
    %c0_4 = arith.constant 0 : index
    %8 = vector.load %arg0[%c0_3, %c0_4] : memref<8x16xf32, #tpu.memory_space<vmem>>, vector<8x16xf32>
    %cst_5 = arith.constant dense<0xFF800000> : vector<8xf32>
    %9 = vector.multi_reduction <maximumf>, %8, %cst_5 [1] : vector<8x16xf32> to vector<8xf32>
    %10 = vector.shape_cast %9 : vector<8xf32> to vector<8x1xf32>
    %11 = vector.broadcast %10 : vector<8x1xf32> to vector<8x16xf32>
    %12 = arith.subf %8, %11 : vector<8x16xf32>
    %13 = math.exp %12 : vector<8x16xf32>
    %cst_6 = arith.constant dense<0.000000e+00> : vector<8xf32>
    %14 = vector.multi_reduction <add>, %13, %cst_6 [1] : vector<8x16xf32> to vector<8xf32>
    %15 = vector.shape_cast %14 : vector<8xf32> to vector<8x1xf32>
    %16 = math.log %15 : vector<8x1xf32>
    %17 = arith.addf %10, %16 : vector<8x1xf32>
    %18 = arith.mulf %8, %6 : vector<8x16xf32>
    %cst_7 = arith.constant dense<0.000000e+00> : vector<8xf32>
    %19 = vector.multi_reduction <add>, %18, %cst_7 [1] : vector<8x16xf32> to vector<8xf32>
    %20 = vector.shape_cast %19 : vector<8xf32> to vector<8x1xf32>
    %21 = arith.subf %17, %20 : vector<8x1xf32>
    %22 = vector.shape_cast %21 : vector<8x1xf32> to vector<1x8x1xf32>
    %cst_8 = arith.constant dense<0.000000e+00> : vector<1xf32>
    %23 = vector.multi_reduction <add>, %22, %cst_8 [1, 2] : vector<1x8x1xf32> to vector<1xf32>
    %24 = vector.shape_cast %23 : vector<1xf32> to vector<1x1x1xf32>
    %25 = vector.extract %24[0, 0, 0] : f32 from vector<1x1x1xf32>
    %26 = vector.broadcast %25 : f32 to vector<1x1xf32>
    %cst_9 = arith.constant 5.000000e-02 : f32
    %27 = vector.broadcast %cst_9 : f32 to vector<1x1xf32>
    %28 = arith.mulf %27, %26 : vector<1x1xf32>
    %29 = arith.addf %7, %28 : vector<1x1xf32>
    %c0_10 = arith.constant 0 : index
    %c0_11 = arith.constant 0 : index
    %30 = vector.load %arg1[%c0_10, %c0_11] : memref<8x16xf32, #tpu.memory_space<vmem>>, vector<8x16xf32>
    %cst_12 = arith.constant dense<0xFF800000> : vector<8xf32>
    %31 = vector.multi_reduction <maximumf>, %30, %cst_12 [1] : vector<8x16xf32> to vector<8xf32>
    %32 = vector.shape_cast %31 : vector<8xf32> to vector<8x1xf32>
    %33 = vector.broadcast %32 : vector<8x1xf32> to vector<8x16xf32>
    %34 = arith.subf %30, %33 : vector<8x16xf32>
    %35 = math.exp %34 : vector<8x16xf32>
    %cst_13 = arith.constant dense<0.000000e+00> : vector<8xf32>
    %36 = vector.multi_reduction <add>, %35, %cst_13 [1] : vector<8x16xf32> to vector<8xf32>
    %37 = vector.shape_cast %36 : vector<8xf32> to vector<8x1xf32>
    %38 = math.log %37 : vector<8x1xf32>
    %39 = arith.addf %32, %38 : vector<8x1xf32>
    %40 = arith.mulf %30, %6 : vector<8x16xf32>
    %cst_14 = arith.constant dense<0.000000e+00> : vector<8xf32>
    %41 = vector.multi_reduction <add>, %40, %cst_14 [1] : vector<8x16xf32> to vector<8xf32>
    %42 = vector.shape_cast %41 : vector<8xf32> to vector<8x1xf32>
    %43 = arith.subf %39, %42 : vector<8x1xf32>
    %44 = vector.shape_cast %43 : vector<8x1xf32> to vector<1x8x1xf32>
    %cst_15 = arith.constant dense<0.000000e+00> : vector<1xf32>
    %45 = vector.multi_reduction <add>, %44, %cst_15 [1, 2] : vector<1x8x1xf32> to vector<1xf32>
    %46 = vector.shape_cast %45 : vector<1xf32> to vector<1x1x1xf32>
    %47 = vector.extract %46[0, 0, 0] : f32 from vector<1x1x1xf32>
    %48 = vector.broadcast %47 : f32 to vector<1x1xf32>
    %cst_16 = arith.constant 7.500000e-02 : f32
    %49 = vector.broadcast %cst_16 : f32 to vector<1x1xf32>
    %50 = arith.mulf %49, %48 : vector<1x1xf32>
    %51 = arith.addf %29, %50 : vector<1x1xf32>
    %c0_17 = arith.constant 0 : index
    %c0_18 = arith.constant 0 : index
    %52 = vector.load %arg2[%c0_17, %c0_18] : memref<8x16xf32, #tpu.memory_space<vmem>>, vector<8x16xf32>
    %cst_19 = arith.constant dense<0xFF800000> : vector<8xf32>
    %53 = vector.multi_reduction <maximumf>, %52, %cst_19 [1] : vector<8x16xf32> to vector<8xf32>
    %54 = vector.shape_cast %53 : vector<8xf32> to vector<8x1xf32>
    %55 = vector.broadcast %54 : vector<8x1xf32> to vector<8x16xf32>
    %56 = arith.subf %52, %55 : vector<8x16xf32>
    %57 = math.exp %56 : vector<8x16xf32>
    %cst_20 = arith.constant dense<0.000000e+00> : vector<8xf32>
    %58 = vector.multi_reduction <add>, %57, %cst_20 [1] : vector<8x16xf32> to vector<8xf32>
    %59 = vector.shape_cast %58 : vector<8xf32> to vector<8x1xf32>
    %60 = math.log %59 : vector<8x1xf32>
    %61 = arith.addf %54, %60 : vector<8x1xf32>
    %62 = arith.mulf %52, %6 : vector<8x16xf32>
    %cst_21 = arith.constant dense<0.000000e+00> : vector<8xf32>
    %63 = vector.multi_reduction <add>, %62, %cst_21 [1] : vector<8x16xf32> to vector<8xf32>
    %64 = vector.shape_cast %63 : vector<8xf32> to vector<8x1xf32>
    %65 = arith.subf %61, %64 : vector<8x1xf32>
    %66 = vector.shape_cast %65 : vector<8x1xf32> to vector<1x8x1xf32>
    %cst_22 = arith.constant dense<0.000000e+00> : vector<1xf32>
    %67 = vector.multi_reduction <add>, %66, %cst_22 [1, 2] : vector<1x8x1xf32> to vector<1xf32>
    %68 = vector.shape_cast %67 : vector<1xf32> to vector<1x1x1xf32>
    %69 = vector.extract %68[0, 0, 0] : f32 from vector<1x1x1xf32>
    %70 = vector.broadcast %69 : f32 to vector<1x1xf32>
    %cst_23 = arith.constant 1.000000e-01 : f32
    %71 = vector.broadcast %cst_23 : f32 to vector<1x1xf32>
    %72 = arith.mulf %71, %70 : vector<1x1xf32>
    %73 = arith.addf %51, %72 : vector<1x1xf32>
    %c0_24 = arith.constant 0 : index
    %c0_25 = arith.constant 0 : index
    %74 = vector.load %arg3[%c0_24, %c0_25] : memref<8x16xf32, #tpu.memory_space<vmem>>, vector<8x16xf32>
    %cst_26 = arith.constant dense<0xFF800000> : vector<8xf32>
    %75 = vector.multi_reduction <maximumf>, %74, %cst_26 [1] : vector<8x16xf32> to vector<8xf32>
    %76 = vector.shape_cast %75 : vector<8xf32> to vector<8x1xf32>
    %77 = vector.broadcast %76 : vector<8x1xf32> to vector<8x16xf32>
    %78 = arith.subf %74, %77 : vector<8x16xf32>
    %79 = math.exp %78 : vector<8x16xf32>
    %cst_27 = arith.constant dense<0.000000e+00> : vector<8xf32>
    %80 = vector.multi_reduction <add>, %79, %cst_27 [1] : vector<8x16xf32> to vector<8xf32>
    %81 = vector.shape_cast %80 : vector<8xf32> to vector<8x1xf32>
    %82 = math.log %81 : vector<8x1xf32>
    %83 = arith.addf %76, %82 : vector<8x1xf32>
    %84 = arith.mulf %74, %6 : vector<8x16xf32>
    %cst_28 = arith.constant dense<0.000000e+00> : vector<8xf32>
    %85 = vector.multi_reduction <add>, %84, %cst_28 [1] : vector<8x16xf32> to vector<8xf32>
    %86 = vector.shape_cast %85 : vector<8xf32> to vector<8x1xf32>
    %87 = arith.subf %83, %86 : vector<8x1xf32>
    %88 = vector.shape_cast %87 : vector<8x1xf32> to vector<1x8x1xf32>
    %cst_29 = arith.constant dense<0.000000e+00> : vector<1xf32>
    %89 = vector.multi_reduction <add>, %88, %cst_29 [1, 2] : vector<1x8x1xf32> to vector<1xf32>
    %90 = vector.shape_cast %89 : vector<1xf32> to vector<1x1x1xf32>
    %91 = vector.extract %90[0, 0, 0] : f32 from vector<1x1x1xf32>
    %92 = vector.broadcast %91 : f32 to vector<1x1xf32>
    %cst_30 = arith.constant 1.250000e-01 : f32
    %93 = vector.broadcast %cst_30 : f32 to vector<1x1xf32>
    %94 = arith.mulf %93, %92 : vector<1x1xf32>
    %95 = arith.addf %73, %94 : vector<1x1xf32>
    %c0_31 = arith.constant 0 : index
    %c0_32 = arith.constant 0 : index
    %96 = vector.load %arg4[%c0_31, %c0_32] : memref<8x32xf32, #tpu.memory_space<vmem>>, vector<8x32xf32>
    %97 = arith.mulf %96, %96 : vector<8x32xf32>
    %cst_33 = arith.constant dense<0.000000e+00> : vector<8xf32>
    %98 = vector.multi_reduction <add>, %97, %cst_33 [1] : vector<8x32xf32> to vector<8xf32>
    %99 = vector.shape_cast %98 : vector<8xf32> to vector<8x1xf32>
    %cst_34 = arith.constant 1.000000e-16 : f32
    %100 = vector.broadcast %cst_34 : f32 to vector<8x1xf32>
    %101 = arith.maximumf %99, %100 : vector<8x1xf32>
    %102 = math.rsqrt %101 : vector<8x1xf32>
    %103 = vector.broadcast %102 : vector<8x1xf32> to vector<8x32xf32>
    %104 = arith.mulf %96, %103 : vector<8x32xf32>
    %105 = arith.truncf %104 : vector<8x32xf32> to vector<8x32xbf16>
    %cst_35 = arith.constant dense<0.000000e+00> : vector<8x8xf32>
    %106 = tpu.matmul %105, %105, %cst_35 {dimension_numbers = #tpu.dot_dimension_numbers<[1], [1], [0], [0], [0, 0, 1, 0], [], []>} : vector<8x32xbf16>, vector<8x32xbf16>, vector<8x8xf32> -> vector<8x8xf32>
    %107 = vector.broadcast %1 : vector<8x1xi32> to vector<8x8xi32>
    %108 = vector.broadcast %0 : vector<1x8xi32> to vector<8x8xi32>
    %109 = arith.cmpi eq, %107, %108 : vector<8x8xi32>
    %110 = arith.extui %109 : vector<8x8xi1> to vector<8x8xi32>
    %111 = arith.sitofp %110 : vector<8x8xi32> to vector<8x8xf32>
    %cst_36 = arith.constant 1.000000e+00 : f32
    %112 = vector.broadcast %cst_36 : f32 to vector<8x8xf32>
    %113 = arith.subf %112, %106 : vector<8x8xf32>
    %114 = arith.mulf %111, %113 : vector<8x8xf32>
    %cst_37 = arith.constant 1.000000e+00 : f32
    %115 = vector.broadcast %cst_37 : f32 to vector<8x8xf32>
    %116 = arith.subf %115, %111 : vector<8x8xf32>
    %cst_38 = arith.constant 4.000000e-01 : f32
    %117 = vector.broadcast %cst_38 : f32 to vector<8x8xf32>
    %118 = arith.subf %106, %117 : vector<8x8xf32>
    %cst_39 = arith.constant 0.000000e+00 : f32
    %119 = vector.broadcast %cst_39 : f32 to vector<8x8xf32>
    %120 = arith.maximumf %118, %119 : vector<8x8xf32>
    %121 = arith.mulf %116, %120 : vector<8x8xf32>
    %122 = arith.addf %114, %121 : vector<8x8xf32>
    %123 = tpu.iota {dimensions = array<i32: 0>} : vector<8x8xi32>
    %124 = tpu.iota {dimensions = array<i32: 1>} : vector<8x8xi32>
    %125 = arith.cmpi eq, %123, %124 : vector<8x8xi32>
    %cst_40 = arith.constant 0.000000e+00 : f32
    %126 = vector.broadcast %cst_40 : f32 to vector<8x8xf32>
    %127 = arith.select %125, %126, %122 : vector<8x8xi1>, vector<8x8xf32>
    %128 = vector.shape_cast %127 : vector<8x8xf32> to vector<1x8x8xf32>
    %cst_41 = arith.constant dense<0.000000e+00> : vector<1xf32>
    %129 = vector.multi_reduction <add>, %128, %cst_41 [1, 2] : vector<1x8x8xf32> to vector<1xf32>
    %130 = vector.shape_cast %129 : vector<1xf32> to vector<1x1x1xf32>
    %131 = vector.extract %130[0, 0, 0] : f32 from vector<1x1x1xf32>
    %132 = vector.broadcast %131 : f32 to vector<1x1xf32>
    %cst_42 = arith.constant 1.562500e-02 : f32
    %133 = vector.broadcast %cst_42 : f32 to vector<1x1xf32>
    %134 = arith.mulf %132, %133 : vector<1x1xf32>
    %135 = arith.addf %95, %134 : vector<1x1xf32>
    %c0_43 = arith.constant 0 : index
    %c0_44 = arith.constant 0 : index
    %136 = vector.load %arg7[%c0_43, %c0_44] : memref<1x1xf32, #tpu.memory_space<vmem>>, vector<1x1xf32>
    tpu.vector_store %arg7[%c0_43, %c0_44], %135 {strides = array<i32>} : memref<1x1xf32, #tpu.memory_space<vmem>>, vector<1x1xf32>,
    return
  }
}

</mosaic_0001>

<bundles_post_ra>
// kernel: tpu_custom_call.1
= control target key start
LH: loop header
LB: loop body
LE: loop exit
PB: predicated region body
PF: predicated region fallthrough
CT: control target
= control target key end

     0   :  { %12 = vsyncpa [#allocation3], 0  ;;  %s564_s0 = inlined_call_operand.vmem [shape: f32[8,16], index: 0, kind: input, shape index: {}]   ;;  %s565_s1 = inlined_call_operand.hbm [shape: f32[8,16], index: 1, kind: input, shape index: {}]   ;;  %s566_s2 = inlined_call_operand.vmem [shape: f32[8,16], index: 2, kind: input, shape index: {}]   ;;  %s567_s3 = inlined_call_operand.hbm [shape: f32[8,16], index: 3, kind: input, shape index: {}]   ;;  %s568_s4 = inlined_call_operand.vmem [shape: f32[8,32], index: 4, kind: input, shape index: {}]   ;;  %s569_s5 = inlined_call_operand.vmem [shape: s32[1,8], index: 5, kind: input, shape index: {}]   ;;  %s570_s6 = inlined_call_operand.vmem [shape: s32[8,1], index: 6, kind: input, shape index: {}]   ;;  %s571_s7 = inlined_call_operand.hbm [shape: f32[1,1], index: 7, kind: output, shape index: {}]  }
   0x1   :  { %13 = vsyncpa [#allocation6], 0 }
   0x2   :  { %14 = vsyncpa [#allocation4], 0  ;;  %s412_s24 = smov [#allocation2]   ;;  %s413_s26 = smov [#allocation5]  }
   0x3   :  { %s23_s25 = sshll.u32 %s412_s24, 4  ;;  %s35_s27 = sshll.u32 %s413_s26, 4  ;;  %s24_s25 = int_to_ptr.vmem [resolvable:$true] %s23_s25  ;;  %s36_s27 = int_to_ptr.vmem [resolvable:$true] %s35_s27 }
   0x4   :  { %s340_s30 = scalar_lea.hbm %s565_s1, 128 }
   0x5   :  { %p341_p0 = scmp.ne.s32.totalorder %s565_s1, %s340_s30  ;;  %p344_p1 = scmp.lt.u32.totalorder %s340_s30, %s565_s1 }
   0x7   :  { %p346_p2 = pnand %p344_p1, %p341_p0 }
   0x9   :  { %349 = shalt.err (!%p346_p2)
}
   0xa   :  { %s350_s12 = scalar_lea.vmem %s24_s25, 128  ;;  %p355_p4 = scmp.lt.s32.totalorder %s24_s25, %s24_s25 }
   0xb   :  { %p351_p3 = scmp.ne.s32.totalorder %s24_s25, %s350_s12  ;;  %p356_p5 = scmp.lt.s32.totalorder %s350_s12, %s350_s12 }
   0xd   :  { %p357_p6 = por %p356_p5, %p355_p4 }
   0xf   :  { %p358_p7 = pnand %p357_p6, %p351_p3 }
  0x11   :  { %361 = shalt.err (!%p358_p7)
}
  0x12   :  { %26 = dma.hbm_to_vmem [thread:$0]  %s565_s1, 128, %s24_s25, [#allocation3]  }
  0x13   :  { %s362_s17 = scalar_lea.hbm %s567_s3, 128 }
  0x14   :  { %p363_p8 = scmp.ne.s32.totalorder %s567_s3, %s362_s17  ;;  %p366_p9 = scmp.lt.u32.totalorder %s362_s17, %s567_s3 }
  0x16   :  { %p368_p10 = pnand %p366_p9, %p363_p8 }
  0x18   :  { %371 = shalt.err (!%p368_p10)
}
  0x19   :  { %s372_s22 = scalar_lea.vmem %s36_s27, 128  ;;  %p377_p12 = scmp.lt.s32.totalorder %s36_s27, %s36_s27 }
  0x1a   :  { %p373_p11 = scmp.ne.s32.totalorder %s36_s27, %s372_s22  ;;  %p378_p13 = scmp.lt.s32.totalorder %s372_s22, %s372_s22 }
  0x1c   :  { %p379_p0 = por %p378_p13, %p377_p12 }
  0x1e   :  { %p380_p1 = pnand %p379_p0, %p373_p11 }
  0x20   :  { %383 = shalt.err (!%p380_p1)
}
  0x21   :  { %38 = dma.hbm_to_vmem [thread:$0]  %s567_s3, 128, %s36_s27, [#allocation6]  }
  0x22   :  { %406 = dma.done.wait [#allocation3], 128  }
  0x23   :  { %407 = vsyncadd [#allocation3], 4294967168 }
  0x24   :  { %408 = dma.done.wait [#allocation6], 128  }
  0x25   :  { %409 = vsyncadd [#allocation6], 4294967168  ;;  %v414_v0 = vmov 0   ;;  %v188_v1 = vld [vmem:[%s568_s4] sm:$0xff]  ;;  %vm190_vm0 = vcmask 261120   ;;  %vm63_vm1 = vcmask 130048   ;;  %v54_v15 = vlaneseq }
  0x26   :  { %320 = vset.pattern.permute.xlu1 %v414_v0  ;;  %321 = vset.pattern.permute.xlu0 %v414_v0  ;;  %v485_v2 = vld [vmem:[#allocation2] sm:$0xff]  ;;  %v189_v3 = vmul.f32 %v188_v1, %v188_v1  ;;  %v157_v10 = vld [vmem:[#allocation5] sm:$0xff]  ;;  %v415_v13 = vmov 0.0   ;;  %vm416_vm2 = vmmov 0   ;;  %vm81_vm4 = vcmask 7168   ;;  %s417_s10 = smov [#allocation7]  }
  0x27   :  { %v96_v4 = vsel %vm63_vm1, %v485_v2, -inf  ;;  %v492_v5 = vld [vmem:[%s566_s2] sm:$0xff]  ;;  %v158_v11 = vsel %vm63_vm1, %v157_v10, -inf  ;;  %298 = vmatprep.subr.bf16.mxu0 %v415_v13  ;;  %300 = vmatprep.mubr.msk.bf16.mxu0 %vm416_vm2, %v415_v13  ;;  %v514_v20 = vand.u32 127, %v54_v15  ;;  %vm259_vm7 = vcmask 64512   ;;  %s281_s11 = sshll.u32 %s417_s10, 4  ;;  %s282_s11 = int_to_ptr.vmem [resolvable:$true] %s281_s11 }
  0x28   :  { %v62_v6 = vld [vmem:[%s564_s0] sm:$0xff]  ;;  %97 = vmax.xlane.f32.xlu1 %v96_v4  ;;  %v191_v7 = vsel %vm190_vm0, %v189_v3, 0.0  ;;  %v127_v8 = vsel %vm63_vm1, %v492_v5, -inf  ;;  %vm273_vm8 = vcmask 0   ;;  %s384_s12 = scalar_lea.vmem %s282_s11, 16  ;;  %s388_s13 = scalar_lea.vmem %s282_s11, 32 }
  0x29   :  { %192 = vadd.xlane.f32.xlu0 %v191_v7  ;;  %v64_v9 = vsel %vm63_vm1, %v62_v6, -inf  ;;  %v53_v12 = vld [vmem:[%s570_s6] sm:$0xff]  ;;  %p385_p2 = scmp.ne.s32.totalorder %s282_s11, %s384_s12  ;;  %p389_p3 = scmp.lt.s32.totalorder %s282_s11, %s282_s11 }
  0x2a   :  { %p390_p4 = scmp.lt.s32.totalorder %s388_s13, %s384_s12 }
  0x2c   :  { %128 = vmax.xlane.f32.xlu1 %v127_v8  ;;  %p391_p5 = por %p390_p4, %p389_p3 }
  0x2d   :  { %65 = vmax.xlane.f32.xlu0 %v64_v9 }
  0x2e   :  { %p392_p6 = pnand %p391_p5, %p385_p2 }
  0x31   :  { %159 = vmax.xlane.f32.xlu0 %v158_v11 }
  0x3d   :  { %57 = vperm.xlu1 %320, %v53_v12  }
  0xb5   :  { %v507_v14 = vpop.xlane.xlu1 %97 }
  0xb6   :  { %v193_v16 = vpop.xlane.xlu0 %192  ;;  %v99_v17 = vsub.f32 %v485_v2, %v507_v14 }
  0xb7   :  { %v194_v18 = vmax.f32 %v193_v16, 1e-16 }
  0xb8   :  { %v100_v22 = vmul.f32 1.442695, %v99_v17 }
  0xb9   :  { %v511_v19 = vpop.xlane.xlu1 %128  ;;  %322 = vrsqrt.f32 %v194_v18  ;;  %v293_v18 = vld [vmem:[%s569_s5] ss:$0 sm:$0xff] }
  0xba   :  { %v66_v21 = vpop.xlane.xlu0 %65  ;;  %v130_v24 = vsub.f32 %v492_v5, %v511_v19  ;;  %324 = vpow2.f32 %v100_v22 }
  0xbb   :  { %v67_v23 = vsub.f32 %v62_v6, %v66_v21 }
  0xbc   :  { %v131_v29 = vmul.f32 1.442695, %v130_v24 }
  0xbd   :  { %v518_v25 = vpop.permute.xlu1 %57  ;;  %v68_v26 = vmul.f32 1.442695, %v67_v23 }
  0xbe   :  { %vm59_vm3 = vcmp.eq.s32.totalorder %v514_v20, %v518_v25  ;;  %v522_v27 = vpop.xlane.xlu0 %159  ;;  %vm245_vm5 = vcmp.eq.s32.totalorder %v518_v25, %v293_v18 }
  0xbf   :  { %v291_v28 = vsel %vm59_vm3, 1.0, %v415_v13  ;;  %326 = vpow2.f32 %v68_v26  ;;  %v161_v30 = vsub.f32 %v157_v10, %v522_v27 }
  0xc0   :  { %v76_v31 = vmul.f32 %v291_v28, %v62_v6  ;;  %328 = vpow2.f32 %v131_v29  ;;  %v108_v46 = vmul.f32 %v291_v28, %v485_v2  ;;  %v139_v48 = vmul.f32 %v291_v28, %v492_v5 }
  0xc1   :  { %v162_v34 = vmul.f32 1.442695, %v161_v30  ;;  %v170_v50 = vmul.f32 %v291_v28, %v157_v10 }
  0xc2   :  { %v77_v32 = vsel %vm63_vm1, %v76_v31, 0.0  ;;  %v109_v47 = vsel %vm63_vm1, %v108_v46, 0.0  ;;  %v140_v49 = vsel %vm63_vm1, %v139_v48, 0.0 }
  0xc3   :  { %78 = vadd.xlane.f32.xlu1 %v77_v32  ;;  %v323_v33 = vpop.eup %322  ;;  %330 = vpow2.f32 %v162_v34  ;;  %v171_v51 = vsel %vm63_vm1, %v170_v50, 0.0 }
  0xc4   :  { %v196_v35 = vmul.f32 %v323_v33, %v188_v1  ;;  %v325_v37 = vpop.eup %324 }
  0xc5   :  { %v102_v41 = vsel %vm63_vm1, %v325_v37, 0.0 }
  0xc6   :  { %v197_v36 = vpack.c.bf16 %v196_v35, %v196_v35 }
  0xc8   :  { %v199_v38 = vsel %vm190_vm0, %v197_v36, 0 }
  0xc9   :  { %v327_v39 = vpop.eup %326  ;;  %299 = vmatpush3.bf16.xpose.msra.mxu0 %v199_v38 }
  0xca   :  { %v70_v40 = vsel %vm63_vm1, %v327_v39, 0.0  ;;  %v329_v42 = vpop.eup %328 }
  0xcb   :  { %71 = vadd.xlane.f32.xlu0 %v70_v40  ;;  %v133_v43 = vsel %vm63_vm1, %v329_v42, 0.0 }
  0xcd   :  { %v331_v44 = vpop.eup %330 }
  0xce   :  { %v164_v45 = vsel %vm63_vm1, %v331_v44, 0.0 }
  0xcf   :  { %103 = vadd.xlane.f32.xlu0 %v102_v41 }
  0xd0   :  { %301 = vmatmul.mubr.msk.bf16.vlgmr.msra.gmra.mrb[0].mxu0 %vm190_vm0, %v197_v36 }
  0xd3   :  { %134 = vadd.xlane.f32.xlu0 %v133_v43 }
  0xd7   :  { %165 = vadd.xlane.f32.xlu0 %v164_v45 }
  0xdb   :  { %110 = vadd.xlane.f32.xlu0 %v109_v47 }
  0xdf   :  { %141 = vadd.xlane.f32.xlu0 %v140_v49 }
  0xe3   :  { %172 = vadd.xlane.f32.xlu0 %v171_v51 }
 0x150   :  { %v79_v58 = vpop.xlane.xlu1 %78 }
 0x158   :  { %v72_v52 = vpop.xlane.xlu0 %71 }
 0x159   :  { %332 = vlog2.f32 %v72_v52 }
 0x15c   :  { %v104_v53 = vpop.xlane.xlu0 %103 }
 0x15d   :  { %334 = vlog2.f32 %v104_v53 }
 0x160   :  { %v135_v54 = vpop.xlane.xlu0 %134 }
 0x161   :  { %336 = vlog2.f32 %v135_v54 }
 0x163   :  { %v333_v55 = vpop.eup %332 }
 0x164   :  { %v74_v56 = vmul.f32 0.6931472, %v333_v55  ;;  %v166_v57 = vpop.xlane.xlu0 %165 }
 0x165   :  { %338 = vlog2.f32 %v166_v57 }
 0x166   :  { %v75_v59 = vadd.f32 %v74_v56, %v66_v21 }
 0x167   :  { %v335_v60 = vpop.eup %334 }
 0x168   :  { %v106_v61 = vmul.f32 0.6931472, %v335_v60  ;;  %v80_v62 = vsub.f32 %v75_v59, %v79_v58  ;;  %v111_v63 = vpop.xlane.xlu0 %110 }
 0x16a   :  { %v107_v0 = vadd.f32 %v106_v61, %v507_v14  ;;  %v82_v1 = vsel %vm81_vm4, %v80_v62, 0.0 }
 0x16b   :  { %v337_v2 = vpop.eup %336  ;;  %83 = vadd.xlane.f32.xlu0 %v82_v1 }
 0x16c   :  { %v137_v3 = vmul.f32 0.6931472, %v337_v2  ;;  %v112_v4 = vsub.f32 %v107_v0, %v111_v63  ;;  %v142_v5 = vpop.xlane.xlu0 %141 }
 0x16e   :  { %v138_v6 = vadd.f32 %v137_v3, %v511_v19  ;;  %v113_v7 = vsel %vm81_vm4, %v112_v4, 0.0  ;;  %v294_v19 = vsel %vm245_vm5, 1.0, %v415_v13 }
 0x16f   :  { %v339_v8 = vpop.eup %338  ;;  %114 = vadd.xlane.f32.xlu0 %v113_v7  ;;  %v250_v28 = vsub.f32 1.0, %v294_v19 }
 0x170   :  { %v168_v9 = vmul.f32 0.6931472, %v339_v8  ;;  %v143_v10 = vsub.f32 %v138_v6, %v142_v5  ;;  %v173_v11 = vpop.xlane.xlu0 %172 }
 0x172   :  { %v169_v12 = vadd.f32 %v168_v9, %v522_v27  ;;  %v144_v14 = vsel %vm81_vm4, %v143_v10, 0.0  ;;  %v256_v27 = vshrl.u32 %v54_v15, 7 }
 0x173   :  { %145 = vadd.xlane.f32.xlu0 %v144_v14 }
 0x174   :  { %v174_v16 = vsub.f32 %v169_v12, %v173_v11  ;;  %vm257_vm6 = vcmp.eq.s32.totalorder %v256_v27, %v514_v20 }
 0x176   :  { %v175_v17 = vsel %vm81_vm4, %v174_v16, 0.0 }
 0x177   :  { %176 = vadd.xlane.f32.xlu0 %v175_v17 }
 0x1a3   :  { %v235_v21 = vpop.f32.mrb[0].mxu0 }
 0x1a4   :  { %v248_v22 = vsub.f32 1.0, %v235_v21  ;;  %v295_v23 = vadd.f32 -0.4, %v235_v21  ;;  %v302_v24 = vpop.f32.mrb[1].mxu0 }
 0x1a5   :  { %v238_v26 = vpop.f32.mrb[2].mxu0 }
 0x1a6   :  { %v252_v29 = vmax.f32 %v295_v23, 0.0  ;;  %v303_v30 = vpop.f32.mrb[3].mxu0  ;;  %v249_v31 = vmul.f32 %v294_v19, %v248_v22 }
 0x1a8   :  { %v253_v32 = vmul.f32 %v252_v29, %v250_v28 }
 0x1aa   :  { %v254_v33 = vadd.f32 %v253_v32, %v249_v31 }
 0x1ac   :  { %v258_v34 = vsel %vm257_vm6, 0.0, %v254_v33 }
 0x1ad   :  { %v260_v25 = vsel %vm259_vm7, %v258_v34, 0.0 }
 0x1ae   :  { %261 = vadd.xlane.f32.xlu0 %v260_v25 }
 0x1f8   :  { %v84_v13 = vpop.xlane.xlu0 %83 }
 0x1f9   :  { %v85_v35 = vrot.slane %v84_v13, 4 }
 0x1fb   :  { %v86_v36 = vadd.f32 %v85_v35, %v84_v13 }
 0x1fc   :  { %v115_v37 = vpop.xlane.xlu0 %114 }
 0x1fd   :  { %v87_v38 = vrot.slane %v86_v36, 2  ;;  %v116_v39 = vrot.slane %v115_v37, 4 }
 0x1ff   :  { %v117_v40 = vadd.f32 %v116_v39, %v115_v37  ;;  %v88_v15 = vadd.f32 %v87_v38, %v86_v36 }
 0x200   :  { %v146_v41 = vpop.xlane.xlu0 %145 }
 0x201   :  { %v118_v42 = vrot.slane %v117_v40, 2  ;;  %v147_v43 = vrot.slane %v146_v41, 4  ;;  %v89_v44 = vrot.slane %v88_v15, 1 }
 0x203   :  { %v148_v45 = vadd.f32 %v147_v43, %v146_v41  ;;  %v90_v46 = vadd.f32 %v89_v44, %v88_v15  ;;  %v119_v20 = vadd.f32 %v118_v42, %v117_v40 }
 0x204   :  { %v177_v47 = vpop.xlane.xlu0 %176 }
 0x205   :  { %v149_v48 = vrot.slane %v148_v45, 2  ;;  %v178_v49 = vrot.slane %v177_v47, 4  ;;  %304 = vpush %v90_v46  ;;  %v120_v50 = vrot.slane %v119_v20, 1 }
 0x207   :  { %v179_v51 = vadd.f32 %v178_v49, %v177_v47  ;;  %v121_v52 = vadd.f32 %v120_v50, %v119_v20  ;;  %v150_v53 = vadd.f32 %v149_v48, %v148_v45 }
 0x209   :  { %v180_v54 = vrot.slane %v179_v51, 2  ;;  %306 = vpush %v121_v52  ;;  %v151_v55 = vrot.slane %v150_v53, 1 }
 0x20b   :  { %v152_v56 = vadd.f32 %v151_v55, %v150_v53  ;;  %v181_v57 = vadd.f32 %v180_v54, %v179_v51 }
 0x20d   :  { %308 = vpush %v152_v56  ;;  %v182_v58 = vrot.slane %v181_v57, 1 }
 0x20f   :  { %v183_v59 = vadd.f32 %v182_v58, %v181_v57 }
 0x211   :  { %310 = vpush %v183_v59 }
 0x236   :  { %s305_s5 = spop %304 }
 0x237   :  { %v92_v4 = vstv %s305_s5 }
 0x238   :  { %v93_v8 = vmul.f32 0.05, %v92_v4 }
 0x23a   :  { %s307_s29 = spop %306 }
 0x23b   :  { %v262_v60 = vpop.xlane.xlu0 %261  ;;  %v123_v3 = vstv %s307_s29 }
 0x23c   :  { %v263_v61 = vrot.slane %v262_v60, 4  ;;  %v124_v6 = vmul.f32 0.075, %v123_v3 }
 0x23e   :  { %v264_v62 = vadd.f32 %v263_v61, %v262_v60  ;;  %s309_s30 = spop %308  ;;  %v125_v10 = vadd.f32 %v124_v6, %v93_v8 }
 0x23f   :  { %v154_v5 = vstv %s309_s30 }
 0x240   :  { %v265_v63 = vrot.slane %v264_v62, 2  ;;  %v155_v9 = vmul.f32 0.1, %v154_v5 }
 0x242   :  { %v266_v0 = vadd.f32 %v265_v63, %v264_v62  ;;  %s311_s8 = spop %310  ;;  %v156_v12 = vadd.f32 %v155_v9, %v125_v10 }
 0x243   :  { %v185_v7 = vstv %s311_s8 }
 0x244   :  { %v267_v1 = vrot.slane %v266_v0, 1  ;;  %v186_v11 = vmul.f32 0.125, %v185_v7 }
 0x246   :  { %v268_v2 = vadd.f32 %v267_v1, %v266_v0  ;;  %v187_v16 = vadd.f32 %v186_v11, %v156_v12 }
 0x248   :  { %312 = vpush %v268_v2 }
 0x279   :  { %s313_s9 = spop %312 }
 0x27a   :  { %v270_v14 = vstv %s313_s9 }
 0x27b   :  { %v271_v17 = vmul.f32 0.015625, %v270_v14 }
 0x27d   :  { %v272_v18 = vadd.f32 %v271_v17, %v187_v16 }
 0x27f   :  { %274 = vst.msk [vmem:[#allocation7] sm:$0x1] %vm273_vm8, %v272_v18 }
 0x280   :  { %395 = shalt.err (!%p392_p6)
}
 0x281   :  { %s396_s16 = scalar_lea.hbm %s571_s7, 16 }
 0x282   :  { %p397_p7 = scmp.ne.s32.totalorder %s571_s7, %s396_s16  ;;  %p400_p8 = scmp.lt.u32.totalorder %s396_s16, %s571_s7 }
 0x284   :  { %p402_p9 = pnand %p400_p8, %p397_p7 }
 0x286   :  { %405 = shalt.err (!%p402_p9)
}
 0x287   :  { %284 = dma.vmem_to_hbm [thread:$0]  %s282_s11, 16, %s571_s7, [#allocation4]  }
 0x288   :  { %410 = dma.done.wait [#allocation4], 16  }
 0x289   :  { %411 = vsyncadd [#allocation4], 4294967280 }
 0x28a   :  { %288 = vsyncpa [#allocation3], 1 }
 0x28b   :  { %289 = vsyncpa [#allocation6], 1 }
 0x28c   :  { %290 = vsyncpa [#allocation4], 1 }

</bundles_post_ra>
